<compile_context>
chip_gen: v5e
topology: v5e:2x2
jax: 0.10.0
libtpu: 0.0.40
codegen_flags: <defaults>
</compile_context>

<pallas_src>
import jax
import jax.numpy as jnp
from jax.experimental import pallas as pl
from jax.experimental.pallas import tpu as pltpu


def _round_up(a, m):
    return ((a + m - 1) // m) * m


def patch_embed_kernel(x_ref, w_ref, pos_ref, o_ref):
    # x_ref:   (TN, Dp_pad)   flattened-patch rows for one (patch-tile, batch)
    # w_ref:   (Dp_pad, E_pad) reshaped conv weight (resident across the grid)
    # pos_ref: (TN, E_pad)    positional embedding + conv bias (batch-shared)
    # o_ref:   (TN, E_pad)
    acc = jnp.dot(x_ref[...], w_ref[...], preferred_element_type=jnp.float32)
    o_ref[...] = (acc + pos_ref[...]).astype(o_ref.dtype)


def patch_embedding_2d(x, conv_w, conv_b, pos_embed, patch_size, row_tile=256):
    """x: (B, C, H, W) NCHW. Returns (B, num_patches, embed_dim)."""
    B, C, H, W = x.shape
    E = conv_w.shape[0]
    p = patch_size
    gh, gw = H // p, W // p
    N = gh * gw
    Dp = C * p * p

    # --- glue: extract non-overlapping patches, flatten order (c, kh, kw) ---
    # (B, C, gh, p, gw, p) -> (B, gh, gw, C, p, p) -> (B, N, C*p*p)
    # TODO(synk): this im2col transpose materializes one HBM copy of the
    # patches; folding it into the pipeline DMA would need a 6-D BlockSpec plus
    # an in-VMEM cross-lane shuffle, which is not a clean win.
    x = x[:, :, :gh * p, :gw * p]
    x_patches = x.reshape(B, C, gh, p, gw, p)
    x_patches = jnp.transpose(x_patches, (0, 2, 4, 1, 3, 5)).reshape(B, N, Dp)

    # conv weight (E, C, p, p) -> (Dp, E), same (c, kh, kw) flatten order.
    w2d = conv_w.reshape(E, Dp).T
    # Fold conv bias into the positional embedding: (N, E), f32 for the add.
    pos_rows = (pos_embed.reshape(N, E) + conv_b[None, :]).astype(jnp.float32)

    # --- alignment: lane-dense last dims, sublane-aligned patch tiles ---
    Dp_pad = _round_up(Dp, 128)
    E_pad = _round_up(E, 128)
    TN = _round_up(min(row_tile, N), 8)     # patch-row tile, multiple of 8
    N_pad = _round_up(N, TN)

    x_p = jnp.pad(x_patches, ((0, 0), (0, N_pad - N), (0, Dp_pad - Dp)))
    w_p = jnp.pad(w2d, ((0, Dp_pad - Dp), (0, E_pad - E)))
    pos_p = jnp.pad(pos_rows, ((0, N_pad - N), (0, E_pad - E)))

    # Grid: (patch tiles, batch) with batch innermost, so the pos tile index
    # (j, 0) is unchanged across consecutive steps -> no per-step re-DMA of the
    # positional embedding, and the weight block (0, 0) is resident throughout.
    grid = (N_pad // TN, B)

    out = pl.pallas_call(
        patch_embed_kernel,
        out_shape=jax.ShapeDtypeStruct((B, N_pad, E_pad), x.dtype),
        grid_spec=pltpu.PrefetchScalarGridSpec(
            num_scalar_prefetch=0,
            grid=grid,
            in_specs=[
                pl.BlockSpec((None, TN, Dp_pad), lambda j, b: (b, j, 0)),
                pl.BlockSpec((Dp_pad, E_pad), lambda j, b: (0, 0)),
                pl.BlockSpec((TN, E_pad), lambda j, b: (j, 0)),
            ],
            out_specs=pl.BlockSpec((None, TN, E_pad), lambda j, b: (b, j, 0)),
        ),
        compiler_params=pltpu.CompilerParams(
            dimension_semantics=("parallel", "parallel")),
    )(x_p, w_p, pos_p)

    return out[:, :N, :E]


if __name__ == "__main__":
    # Small shapes consistent with the module:
    # in_channels=4, img_size=16, patch_size=4 -> grid 4x4 = 16 patches,
    # embed_dim=32, batch=2.
    B, C, IMG, P, E = 2, 4, 16, 4, 32
    N = (IMG // P) ** 2
    Dp = C * P * P

    key = jax.random.PRNGKey(0)
    k_x, k_w, k_b, k_pos = jax.random.split(key, 4)

    x = jax.random.normal(k_x, (B, C, IMG, IMG), dtype=jnp.float32)
    # Deterministic synthetic params (shapes match nn.Conv2d / nn.Parameter)
    conv_w = jax.random.normal(k_w, (E, C, P, P), dtype=jnp.float32) * 0.02
    conv_b = jax.random.normal(k_b, (E,), dtype=jnp.float32) * 0.02
    pos_embed = (jax.random.truncated_normal(
        k_pos, -2.0, 2.0, (1, N, E), dtype=jnp.float32) * 0.02)

    out = patch_embedding_2d(x, conv_w, conv_b, pos_embed, patch_size=P)
    out = jax.block_until_ready(out)

    # Reference check in plain JAX (same math as the PyTorch forward)
    xp = x.reshape(B, C, IMG // P, P, IMG // P, P)
    xp = jnp.transpose(xp, (0, 2, 4, 1, 3, 5)).reshape(B, N, Dp)
    ref = xp @ conv_w.reshape(E, Dp).T + conv_b[None, None, :] + pos_embed
    assert out.shape == (B, N, E)
    assert jnp.allclose(out, ref, atol=1e-5, rtol=1e-5)

    print("KERNEL_OK")
</pallas_src>

<mosaic_0001>
module attributes {stable_mosaic.version = 11 : i64} {
  func.func @patch_embed_kernel(%arg0: i32, %arg1: i32, %arg2: memref<1x16x128xf32, #tpu.memory_space<vmem>>, %arg3: memref<128x128xf32, #tpu.memory_space<vmem>>, %arg4: memref<16x128xf32, #tpu.memory_space<vmem>>, %arg5: memref<1x16x128xf32, #tpu.memory_space<vmem>>) attributes {dimension_semantics = [#tpu.dimension_semantics<parallel>, #tpu.dimension_semantics<parallel>], iteration_bounds = array<i64: 1, 2>, scalar_prefetch = 0 : i64, scratch_operands = 0 : i64, tpu.core_type = #tpu.core_type<tc>, window_params = [{transform_indices = @transform_0, window_bounds = array<i64: 1, 16, 128>}, {pipeline_mode = #tpu.pipeline_mode<synchronous>, transform_indices = @transform_1, window_bounds = array<i64: 128, 128>}, {transform_indices = @transform_2, window_bounds = array<i64: 16, 128>}, {transform_indices = @transform_3, window_bounds = array<i64: 1, 16, 128>}]} {
    %c0 = arith.constant 0 : index
    %c0_0 = arith.constant 0 : index
    %c0_1 = arith.constant 0 : index
    %0 = vector.load %arg2[%c0, %c0_0, %c0_1] : memref<1x16x128xf32, #tpu.memory_space<vmem>>, vector<1x16x128xf32>
    %1 = vector.shape_cast %0 : vector<1x16x128xf32> to vector<16x128xf32>
    %c0_2 = arith.constant 0 : index
    %c0_3 = arith.constant 0 : index
    %2 = vector.load %arg3[%c0_2, %c0_3] : memref<128x128xf32, #tpu.memory_space<vmem>>, vector<128x128xf32>
    %cst = arith.constant dense<0.000000e+00> : vector<16x128xf32>
    %3 = tpu.matmul %1, %2, %cst {dimension_numbers = #tpu.dot_dimension_numbers<[1], [0], [0], [1], [0, 0, 1, 1], [], []>} : vector<16x128xf32>, vector<128x128xf32>, vector<16x128xf32> -> vector<16x128xf32>
    %c0_4 = arith.constant 0 : index
    %c0_5 = arith.constant 0 : index
    %4 = vector.load %arg4[%c0_4, %c0_5] : memref<16x128xf32, #tpu.memory_space<vmem>>, vector<16x128xf32>
    %5 = arith.addf %3, %4 : vector<16x128xf32>
    %c0_6 = arith.constant 0 : index
    %c0_7 = arith.constant 0 : index
    %c0_8 = arith.constant 0 : index
    %6 = vector.load %arg5[%c0_6, %c0_7, %c0_8] : memref<1x16x128xf32, #tpu.memory_space<vmem>>, vector<1x16x128xf32>
    %7 = vector.shape_cast %6 : vector<1x16x128xf32> to vector<16x128xf32>
    %8 = vector.shape_cast %5 : vector<16x128xf32> to vector<1x16x128xf32>
    tpu.vector_store %arg5[%c0_6, %c0_7, %c0_8], %8 {strides = array<i32>} : memref<1x16x128xf32, #tpu.memory_space<vmem>>, vector<1x16x128xf32>,
    return
  }
  func.func @transform_0(%arg0: i32, %arg1: i32) -> (i32, i32, i32) {
    %c0_i32 = arith.constant 0 : i32
    %c0_i32_0 = arith.constant 0 : i32
    return %arg1, %arg0, %c0_i32 : i32, i32, i32
  }
  func.func @transform_1(%arg0: i32, %arg1: i32) -> (i32, i32) {
    %c0_i32 = arith.constant 0 : i32
    %c0_i32_0 = arith.constant 0 : i32
    %c0_i32_1 = arith.constant 0 : i32
    return %c0_i32, %c0_i32_0 : i32, i32
  }
  func.func @transform_2(%arg0: i32, %arg1: i32) -> (i32, i32) {
    %c0_i32 = arith.constant 0 : i32
    %c0_i32_0 = arith.constant 0 : i32
    return %arg0, %c0_i32 : i32, i32
  }
  func.func @transform_3(%arg0: i32, %arg1: i32) -> (i32, i32, i32) {
    %c0_i32 = arith.constant 0 : i32
    %c0_i32_0 = arith.constant 0 : i32
    return %arg1, %arg0, %c0_i32 : i32, i32, i32
  }
}

</mosaic_0001>

<bundles_post_ra>
// kernel: tpu_custom_call.1
= control target key start
LH: loop header
LB: loop body
LE: loop exit
PB: predicated region body
PF: predicated region fallthrough
CT: control target
= control target key end

     0   :  { %8 = vsyncpa [#allocation3], 0  ;;  %s915_s0 = inlined_call_operand.hbm [shape: f32[2,16,128], index: 0, kind: input, shape index: {}]   ;;  %s916_s1 = inlined_call_operand.hbm [shape: f32[128,128], index: 1, kind: input, shape index: {}]   ;;  %s917_s2 = inlined_call_operand.hbm [shape: f32[16,128], index: 2, kind: input, shape index: {}]   ;;  %s918_s3 = inlined_call_operand.hbm [shape: f32[2,16,128], index: 3, kind: output, shape index: {}]  }
   0x1   :  { %10 = vsyncpa [#allocation3 + $0x1], 0 }
   0x2   :  { %11 = vsyncpa [#allocation6], 0 }
   0x3   :  { %12 = vsyncpa [#allocation4], 0 }
   0x4   :  { %14 = vsyncpa [#allocation4 + $0x1], 0  ;;  %s752_s12 = smov 0   ;;  %s754_s13 = smov 0  }
   0x5   :  { %s756_s14 = smov 0   ;;  %s758_s15 = smov 0  }
   0x6   :  { %s760_s16 = smov 0   ;;  %s762_s17 = smov 0  }
   0x7 LB: > { %s424_s18 = sadd.s32 4294967295, %s724_s17   ;;  %s425_s19 = sadd.s32 4294967294, %s724_s17   ;;  %s724_s17 = sphi %s762_s17, %s20_s17   ;;  %s720_s16 = sphi %s760_s16, %s928_s16   ;;  %s716_s15 = sphi %s758_s15, %s927_s15   ;;  %s712_s14 = sphi %s756_s14, %s926_s14   ;;  %s708_s13 = sphi %s754_s13, %s925_s13   ;;  %s704_s12 = sphi %s752_s12, %s924_s12  }
   0x8   : > { %p54_p0 = scmp.ne.s32.totalorder %s708_s13, %s704_s12  ;;  %p788_p1 = scmp.eq.s32.totalorder %s424_s18, 0 }
   0x9   : > { %p133_p2 = scmp.eq.s32.totalorder %s425_s19, 1  ;;  %p426_p4 = scmp.ge.s32.totalorder %s724_s17, 1 }
   0xa   : > { %p794_p3 = por %p788_p1, %p54_p0  ;;  %p140_p6 = scmp.lt.s32.totalorder %s724_s17, 3 }
   0xb   : > { %p799_p5 = por %p133_p2, %p54_p0  ;;  %s151_s25 = sshll.u32 %s916_s1, 4  ;;  %s152_s25 = int_to_ptr.hbm [resolvable:$true] %s151_s25 }
   0xc   : > { %p807_p7 = pnand %p426_p4, %p140_p6  ;;  %s726_s27 = smov [#allocation5]  }
   0xd   : > { %s153_s28 = sshll.u32 %s726_s27, 4  ;;  %p429_p10 = scmp.ge.s32.totalorder %s724_s17, 2  ;;  %s154_s28 = int_to_ptr.vmem [resolvable:$true] %s153_s28 }
   0xe   : > { %p473_p8 = pneg %p807_p7  ;;  %s168_s4 = sshll.u32 %s917_s2, 4  ;;  %s169_s4 = int_to_ptr.hbm [resolvable:$true] %s168_s4 }
   0xf   : > { %s727_s5 = smov 128   ;;  %s728_s6 = smov 8  }
  0x10   : > { %p474_p9 = pnand %p473_p8, %p788_p1  ;;  %s729_s7 = smov [#allocation7]  }
  0x11   : > { %s170_s8 = sshll.u32 %s729_s7, 4  ;;  %p127_p11 = scmp.eq.s32.totalorder %s424_s18, 1  ;;  %s171_s8 = int_to_ptr.vmem [resolvable:$true] %s170_s8 }
  0x12   : > { %476 = dma.hbm_to_vmem [thread:$0]  (!%p474_p9), %s152_s25, 2048, %s154_s28, [#allocation6], %s727_s5, %s727_s5, %s728_s6  }
  0x13   : > { %479 = dma.hbm_to_vmem [thread:$0]  (!%p474_p9), %s169_s4, 256, %s171_s8, [#allocation6], %s727_s5, %s727_s5, %s728_s6  }
  0x14   : > { %s29_s9 = sadd.s32 1, %s720_s16  ;;  %s41_s10 = sadd.s32 1, %s712_s14 }
  0x15   : > { %p30_p12 = scmp.ge.s32.totalorder %s29_s9, 2  ;;  %p48_p13 = scmp.ne.s32.totalorder %s712_s14, %s708_s13 }
  0x16   : > { %p49_p0 = scmp.eq.s32.totalorder %s724_s17, 0  ;;  %p490_p4 = scmp.lt.s32.totalorder %s724_s17, 2 }
  0x17   : > { %s930_s9 = smov (%p30_p12, %s29_s9), 0  ;;  %p834_p2 = por %p127_p11, %p48_p13 }
  0x18   : > { %s36_s19 = ssub.s32 %s720_s16, %s930_s9  ;;  %s184_s23 = sand.u32 1, %s712_s14  }
  0x19   : > { %p39_p6 = scmp.eq.s32.totalorder %s36_s19, 0  ;;  %p50_p8 = por %p49_p0, %p48_p13 }
  0x1a   : > { %s430_s24 = sshll.u32 %s184_s23, 4  ;;  %s443_s18 = sshll.u32 %s720_s16, 4 }
  0x1b   : > { %s844_s25 = scalar_select %p39_p6, %s712_s14, %s41_s10  }
  0x1c   : > { %s195_s29 = scalar_lea.hbm %s915_s0, %s443_s18  ;;  %s188_s4 = scalar_lea.vmem [#allocation2], %s430_s24 }
  0x1d   : > { %s196_s30 = sshll.u32 %s195_s29, 4  ;;  %s198_s7 = sshll.u32 %s188_s4, 4  ;;  %s197_s30 = int_to_ptr.hbm [resolvable:$true] %s196_s30  ;;  %s199_s7 = int_to_ptr.vmem [resolvable:$true] %s198_s7 }
  0x1e   : > { %p481_p9 = pnand %p490_p4, %p50_p8  ;;  %s185_s8 = scalar_lea.sflag [#allocation3], %s184_s23 }
  0x1f   : > { %210 = sbr.rel (%p807_p7) target bundleno = 204 (0xcc), region = 32  ;;  %s857_s10 = sand.u32 (!%p807_p7), 1, %s708_s13  }
  0x20   : > { %483 = dma.hbm_to_vmem [thread:$0]  (!%p481_p9), %s197_s30, 256, %s199_s7, %s185_s8, %s727_s5, %s727_s5, %s728_s6  }
  0x21   : > { %s434_s19 = sshll.u32 (!%p807_p7), %s857_s10, 4  ;;  %s213_s24 = scalar_lea.sflag (!%p807_p7), [#allocation3], %s857_s10 }
  0x22   : > { %s863_s18 = scalar_lea.vmem (!%p807_p7), [#allocation2], %s434_s19 }
  0x24   : > { %691 = dma.done.wait (%p794_p3), %s213_s24, 256  }
  0x25   : > { %693 = vsyncadd (%p794_p3), %s213_s24, 4294967040 }
  0x26   : > { %695 = dma.done.wait (%p788_p1), [#allocation6], 2304  }
  0x27   : > { %697 = vsyncadd (%p788_p1), [#allocation6], 4294964992  ;;  %v270_v0 = vld [vmem:[#allocation5 + $0x78] sm:$0xff]  ;;  %v269_v1 = vld [vmem:[#allocation5 + $0x70] sm:$0xff]  ;;  %s444_s20 = sshll.u32 %s716_s15, 4  ;;  %s249_s6 = scalar_lea.vmem [#allocation8], %s434_s19 }
  0x28   : > { %273 = vmatpush.msra.mxu0 %v270_v0  ;;  %445 = vmatpush.msra.mxu1 %v270_v0  ;;  %v268_v2 = vld [vmem:[#allocation5 + $0x68] sm:$0xff]  ;;  %v267_v3 = vld [vmem:[#allocation5 + $0x60] sm:$0xff]  ;;  %v266_v4 = vld [vmem:[#allocation5 + $0x58] sm:$0xff]  ;;  %s312_s5 = scalar_lea.hbm %s918_s3, %s444_s20  ;;  %s313_s23 = sshll.u32 %s249_s6, 4  ;;  %s314_s23 = int_to_ptr.vmem [resolvable:$true] %s313_s23 }
  0x29   : > { %v265_v5 = vld [vmem:[#allocation5 + $0x50] sm:$0xff]  ;;  %v264_v6 = vld [vmem:[#allocation5 + $0x48] sm:$0xff]  ;;  %v263_v7 = vld [vmem:[#allocation5 + $0x40] sm:$0xff]  ;;  %s315_s27 = sshll.u32 %s312_s5, 4  ;;  %s299_s15 = scalar_lea.sflag [#allocation4], %s857_s10  ;;  %s316_s27 = int_to_ptr.hbm [resolvable:$true] %s315_s27 }
  0x2a   : > { %274 = vmatpush.msra.mxu0 %v269_v1  ;;  %446 = vmatpush.msra.mxu1 %v269_v1  ;;  %v262_v8 = vld [vmem:[#allocation5 + $0x38] sm:$0xff]  ;;  %v261_v9 = vld [vmem:[#allocation5 + $0x30] sm:$0xff]  ;;  %v260_v10 = vld [vmem:[#allocation5 + $0x28] sm:$0xff]  ;;  %s652_s28 = sshra.s32 %s316_s27, 4  ;;  %s658_s7 = scalar_lea.hbm %s918_s3, 32  ;;  %s653_s28 = int_to_ptr.hbm [resolvable:$true] %s652_s28 }
  0x2b   : > { %v259_v11 = vld [vmem:[#allocation5 + $0x20] sm:$0xff]  ;;  %v258_v12 = vld [vmem:[#allocation5 + $0x18] sm:$0xff]  ;;  %v257_v13 = vld [vmem:[#allocation5 + $0x10] sm:$0xff]  ;;  %s654_s29 = scalar_lea.hbm %s653_s28, 16  ;;  %p659_p11 = scmp.lt.s32.totalorder %s653_s28, %s918_s3 }
  0x2c   : > { %275 = vmatpush.msra.mxu0 %v268_v2  ;;  %447 = vmatpush.msra.mxu1 %v268_v2  ;;  %v256_v14 = vld [vmem:[#allocation5 + $0x8] sm:$0xff]  ;;  %v255_v15 = vld [vmem:[#allocation5] sm:$0xff]  ;;  %p655_p1 = scmp.ne.s32.totalorder %s653_s28, %s654_s29  ;;  %p660_p12 = scmp.lt.s32.totalorder %s658_s7, %s654_s29 }
  0x2d   : > { %v253_v16 = vld [vmem:[%s863_s18] sm:$0xff]  ;;  %v254_v17 = vld [vmem:[%s863_s18 + $0x8] sm:$0xff] }
  0x2e   : > { %276 = vmatpush.msra.mxu0 %v267_v3  ;;  %448 = vmatpush.msra.mxu1 %v267_v3  ;;  %v271_v18 = vld [vmem:[#allocation7] sm:$0xff]  ;;  %v272_v19 = vld [vmem:[#allocation7 + $0x8] sm:$0xff]  ;;  %p656_p3 = pnand %p655_p1, %p834_p2  ;;  %p661_p13 = por %p660_p12, %p659_p11 }
  0x30   : > { %277 = vmatpush.msra.mxu0 %v266_v4  ;;  %449 = vmatpush.msra.mxu1 %v266_v4  ;;  %p657_p7 = pneg %p656_p3 }
  0x32   : > { %278 = vmatpush.msra.mxu0 %v265_v5  ;;  %450 = vmatpush.msra.mxu1 %v265_v5  ;;  %p662_p0 = pnand %p661_p13, %p657_p7 }
  0x34   : > { %279 = vmatpush.msra.mxu0 %v264_v6  ;;  %451 = vmatpush.msra.mxu1 %v264_v6 }
  0x36   : > { %280 = vmatpush.msra.mxu0 %v263_v7  ;;  %452 = vmatpush.msra.mxu1 %v263_v7 }
  0x38   : > { %281 = vmatpush.msra.mxu0 %v262_v8  ;;  %453 = vmatpush.msra.mxu1 %v262_v8 }
  0x3a   : > { %282 = vmatpush.msra.mxu0 %v261_v9  ;;  %454 = vmatpush.msra.mxu1 %v261_v9 }
  0x3c   : > { %283 = vmatpush.msra.mxu0 %v260_v10  ;;  %455 = vmatpush.msra.mxu1 %v260_v10 }
  0x3e   : > { %284 = vmatpush.msra.mxu0 %v259_v11  ;;  %456 = vmatpush.msra.mxu1 %v259_v11 }
  0x40   : > { %285 = vmatpush.msra.mxu0 %v258_v12  ;;  %457 = vmatpush.msra.mxu1 %v258_v12 }
  0x42   : > { %286 = vmatpush.msra.mxu0 %v257_v13  ;;  %458 = vmatpush.msra.mxu1 %v257_v13 }
  0x44   : > { %287 = vmatpush.msra.mxu0 %v256_v14  ;;  %459 = vmatpush.msra.mxu1 %v256_v14 }
  0x46   : > { %288 = vmatpush.msra.mxu0 %v255_v15  ;;  %460 = vmatpush.msra.mxu1 %v255_v15 }
  0x47   : > { %289 = vmatmul.f32.vlgmr.msra.gmra.mxu0 %v253_v16  ;;  %292 = vmatmul.f32.vlgmr.msra.gmra.mxu1 %v254_v17 }
  0xc4   : > { %v290_v20 = vpop.f32.mrf.mxu0  ;;  %v293_v21 = vpop.f32.mrf.mxu1 }
  0xc5   : > { %v291_v22 = vadd.f32 %v290_v20, %v271_v18  ;;  %v294_v23 = vadd.f32 %v293_v21, %v272_v19 }
  0xc7   : > { %296 = vst [vmem:[%s249_s6] sm:$0xff] %v291_v22 }
  0xc8   : > { %297 = vst [vmem:[%s249_s6 + $0x8] sm:$0xff] %v294_v23 }
  0xc9   : > { %665 = shalt.err (!%p662_p0)
}
  0xca   : > { %s730_s10 = smov 128   ;;  %s731_s24 = smov 8  }
  0xcb   : > { %471 = dma.vmem_to_hbm [thread:$0]  (%p834_p2), %s314_s23, 256, %s316_s27, %s299_s15, %s730_s10, %s730_s10, %s731_s24  }
  0xcc PF: > { %s330_s18 = sand.u32 1, %s704_s12   ;;  %p485_p4 = pnand %p429_p10, %p799_p5 }
  0xcd   : > { %s331_s20 = scalar_lea.sflag [#allocation4], %s330_s18 }
  0xce   : > { %p486_p6 = pneg %p485_p4 }
  0xd0   : > { %699 = dma.done.wait (%p486_p6), %s331_s20, 256  }
  0xd1   : > { %701 = vsyncadd (%p486_p6), %s331_s20, 4294967040  ;;  %s20_s17 = sadd.s32 1, %s724_s17   ;;  %s924_s12 = smov %s708_s13 }
  0xd2   : > { %p17_p8 = scmp.ge.s32.totalorder %s20_s17, 4   ;;  %s925_s13 = smov %s712_s14 }
  0xd3   : > { %s926_s14 = smov %s844_s25  ;;  %s927_s15 = smov %s720_s16 }
  0xd4   : > { %s928_s16 = smov %s930_s9  ;;  %19 = sbr.rel (!%p17_p8) target bundleno = 7 (0x7), region = 86 }
  0xd9   :  { %337 = vsyncpa [#allocation3], 1 }
  0xda   :  { %339 = vsyncpa [#allocation3 + $0x1], 1 }
  0xdb   :  { %340 = vsyncpa [#allocation6], 1 }
  0xdc   :  { %341 = vsyncpa [#allocation4], 1 }
  0xdd   :  { %343 = vsyncpa [#allocation4 + $0x1], 1 }

</bundles_post_ra>
